<compile_context>
chip_gen: v6e
topology: v6e:2x2x1
jax: 0.10.0
libtpu: 0.0.40
codegen_flags: <defaults>
</compile_context>

<pallas_src>
import functools

import jax
import jax.numpy as jnp
from jax.experimental import pallas as pl
from jax.experimental.pallas import tpu as pltpu


# ---------------------------------------------------------------------------
# Kernels
# ---------------------------------------------------------------------------
def _bert_output_resident_kernel(x_ref, w_ref, b_ref, res_ref, g_ref, beta_ref,
                                 out_ref, *, eps):
    """One token tile: full-K dot against the VMEM-resident weight, with a
    fused bias + residual + LayerNorm epilogue (single store)."""
    h = jnp.dot(x_ref[...], w_ref[...], preferred_element_type=jnp.float32)
    h = h + b_ref[...] + res_ref[...]
    # TODO(synk): dropout is identity (eval mode); training-mode RNG dropout
    # is not implemented.
    mean = jnp.mean(h, axis=-1, keepdims=True)
    centered = h - mean
    var = jnp.mean(centered * centered, axis=-1, keepdims=True)
    normed = centered * jax.lax.rsqrt(var + eps)
    out_ref[...] = (normed * g_ref[...] + beta_ref[...]).astype(out_ref.dtype)


def _bert_output_ktiled_kernel(x_ref, w_ref, b_ref, res_ref, g_ref, beta_ref,
                               out_ref, *, eps):
    """Fallback for weights too large to keep resident: grid = (m, k) with the
    reduction axis last, accumulating directly into the f32 out_ref."""
    k = pl.program_id(1)
    partial = jnp.dot(x_ref[...], w_ref[...], preferred_element_type=jnp.float32)

    @pl.when(k == 0)
    def _init():
        out_ref[...] = partial

    @pl.when(k > 0)
    def _accumulate():
        out_ref[...] = out_ref[...] + partial

    @pl.when(k == pl.num_programs(1) - 1)
    def _finalize():
        h = out_ref[...] + b_ref[...] + res_ref[...]
        # TODO(synk): dropout identity (eval mode).
        mean = jnp.mean(h, axis=-1, keepdims=True)
        centered = h - mean
        var = jnp.mean(centered * centered, axis=-1, keepdims=True)
        normed = centered * jax.lax.rsqrt(var + eps)
        out_ref[...] = (normed * g_ref[...] + beta_ref[...]).astype(out_ref.dtype)


# ---------------------------------------------------------------------------
# Generation-aware tiling
# ---------------------------------------------------------------------------
def _round_up(x, m):
    return ((x + m - 1) // m) * m


def _vmem_budget_bytes():
    """~75% of per-core physical VMEM; conservative 64 MiB (v7x) if the query
    is unavailable."""
    cap = 64 << 20
    try:
        info = pltpu.get_tpu_info()
        cap = int(getattr(info, "vmem_capacity_bytes", cap))
    except Exception:
        pass
    return (cap * 3) // 4


_TM_CANDIDATES = (2048, 1024, 512, 256, 128, 64, 32, 16, 8)
_TK_CANDIDATES = (1024, 512, 384, 256, 128)


def _select_plan(M, I, H, x_bytes, w_bytes, budget):
    """Returns (mode, TM, TK) with mode in {"resident", "ktiled"}."""
    m8 = _round_up(M, 8)
    h_pad = _round_up(H, 128)
    small = 6 * h_pad * 4  # bias/gamma/beta (double-buffered); negligible
    i_pad = _round_up(I, 128)

    # Prefer >= 2 token tiles (v7x megacore load balance); else one 8-row tile.
    tms = [t for t in _TM_CANDIDATES if 2 * t <= m8]
    if not tms:
        tms = [8]

    def resident_fits(tm):
        w_vmem = 2 * i_pad * h_pad * w_bytes           # resident weight (conservative 2 bufs)
        x_vmem = 2 * tm * i_pad * x_bytes              # double-buffered activation tile
        ro_vmem = 2 * tm * h_pad * 4 * 2               # residual + output tiles, f32
        return w_vmem + x_vmem + ro_vmem + small <= budget

    for tm in tms:
        if resident_fits(tm):
            return "resident", tm, I

    def ktiled_fits(tm, tk):
        w_vmem = 2 * tk * h_pad * w_bytes
        x_vmem = 2 * tm * tk * x_bytes
        ro_vmem = 2 * tm * h_pad * 4 * 2
        return w_vmem + x_vmem + ro_vmem + small <= budget

    for tm in tms:
        for tk in _TK_CANDIDATES:
            if I % tk == 0 and ktiled_fits(tm, tk):
                return "ktiled", tm, tk

    # Last resort: smallest token tile.
    tk = 128 if I % 128 == 0 else I
    return ("ktiled" if tk != I else "resident"), tms[-1], tk


# ---------------------------------------------------------------------------
# Parameter prep (one-time; hoisted out of the per-call path)
# ---------------------------------------------------------------------------
def prepare_params(params, compute_dtype=jnp.bfloat16):
    """Transpose torch-layout (H, I) weight to (I, H), cast to the matmul
    compute dtype, reshape LN/bias vectors to (1, H)."""
    w_t = jnp.asarray(params["dense_weight"])           # (H, I) torch Linear layout
    H = w_t.shape[0]
    return {
        "w_ih": jnp.asarray(w_t.T, dtype=compute_dtype),  # (I, H)
        "bias": jnp.asarray(params["dense_bias"], jnp.float32).reshape(1, H),
        "gamma": jnp.asarray(params["ln_gamma"], jnp.float32).reshape(1, H),
        "beta": jnp.asarray(params["ln_beta"], jnp.float32).reshape(1, H),
    }


# ---------------------------------------------------------------------------
# Wrapper
# ---------------------------------------------------------------------------
def bert_output(hidden_states, input_tensor, prepared, *, eps=1e-12):
    """Fused BertOutput forward.

    hidden_states: (B, S, intermediate_size)
    input_tensor : (B, S, hidden_size)  residual
    prepared     : output of prepare_params()
    Returns (B, S, hidden_size) float32.
    """
    w = prepared["w_ih"]                                 # (I, H) compute dtype
    bias, gamma, beta = prepared["bias"], prepared["gamma"], prepared["beta"]

    B, S, I = hidden_states.shape
    H = w.shape[1]
    M = B * S

    compute_dtype = w.dtype
    x = hidden_states.reshape(M, I).astype(compute_dtype)   # bf16 matmul operand
    res = input_tensor.reshape(M, H).astype(jnp.float32)

    budget = _vmem_budget_bytes()
    itemsize = jnp.dtype(compute_dtype).itemsize
    mode, TM, TK = _select_plan(M, I, H, itemsize, itemsize, budget)

    M_pad = _round_up(M, TM)
    if M_pad != M:
        # Zero-padded rows are LayerNorm-safe (var=0 -> normed=0); sliced off below.
        x = jnp.pad(x, ((0, M_pad - M), (0, 0)))
        res = jnp.pad(res, ((0, M_pad - M), (0, 0)))
    nm = M_pad // TM

    if mode == "resident":
        grid = (nm,)
        kernel = functools.partial(_bert_output_resident_kernel, eps=eps)
        in_specs = [
            pl.BlockSpec((TM, I), lambda i: (i, 0)),   # activations tile
            pl.BlockSpec((I, H), lambda i: (0, 0)),    # resident weight (fetched once)
            pl.BlockSpec((1, H), lambda i: (0, 0)),    # dense bias
            pl.BlockSpec((TM, H), lambda i: (i, 0)),   # residual tile
            pl.BlockSpec((1, H), lambda i: (0, 0)),    # LN gamma
            pl.BlockSpec((1, H), lambda i: (0, 0)),    # LN beta
        ]
        out_specs = pl.BlockSpec((TM, H), lambda i: (i, 0))
        dim_sem = ("parallel",)
    else:
        nk = I // TK
        grid = (nm, nk)
        kernel = functools.partial(_bert_output_ktiled_kernel, eps=eps)
        in_specs = [
            pl.BlockSpec((TM, TK), lambda i, k: (i, k)),
            pl.BlockSpec((TK, H), lambda i, k: (k, 0)),
            pl.BlockSpec((1, H), lambda i, k: (0, 0)),
            pl.BlockSpec((TM, H), lambda i, k: (i, 0)),
            pl.BlockSpec((1, H), lambda i, k: (0, 0)),
            pl.BlockSpec((1, H), lambda i, k: (0, 0)),
        ]
        out_specs = pl.BlockSpec((TM, H), lambda i, k: (i, 0))
        dim_sem = ("parallel", "arbitrary")

    out_flat = pl.pallas_call(
        kernel,
        out_shape=jax.ShapeDtypeStruct((M_pad, H), jnp.float32),
        grid_spec=pltpu.PrefetchScalarGridSpec(
            num_scalar_prefetch=0,
            grid=grid,
            in_specs=in_specs,
            out_specs=out_specs,
        ),
        compiler_params=pltpu.CompilerParams(
            dimension_semantics=dim_sem,
            vmem_limit_bytes=int(budget),
        ),
    )(x, w, bias, res, gamma, beta)

    return out_flat[:M].reshape(B, S, H)


# ---------------------------------------------------------------------------
# Pure-JAX reference (matches the PyTorch forward in eval mode)
# ---------------------------------------------------------------------------
def _reference(hidden_states, input_tensor, params, eps=1e-12):
    h = jnp.einsum("bsi,hi->bsh", hidden_states, params["dense_weight"])
    h = h + params["dense_bias"]
    h = h + input_tensor
    mean = jnp.mean(h, axis=-1, keepdims=True)
    var = jnp.mean(jnp.square(h - mean), axis=-1, keepdims=True)
    n = (h - mean) / jnp.sqrt(var + eps)
    return n * params["ln_gamma"] + params["ln_beta"]


if __name__ == "__main__":
    # Small synthetic config (intermediate_size = 4 * hidden_size as in BERT).
    batch = 2
    seq = 8
    hidden_size = 32
    intermediate_size = 128
    layer_norm_eps = 1e-12

    key = jax.random.PRNGKey(0)
    k_x, k_r, k_w, k_b, k_g, k_be = jax.random.split(key, 6)

    hidden_states = jax.random.normal(
        k_x, (batch, seq, intermediate_size), jnp.float32)
    input_tensor = jax.random.normal(
        k_r, (batch, seq, hidden_size), jnp.float32)

    params = {
        "dense_weight": 0.02 * jax.random.normal(
            k_w, (hidden_size, intermediate_size), jnp.float32),
        "dense_bias": 0.02 * jax.random.normal(
            k_b, (hidden_size,), jnp.float32),
        "ln_gamma": 1.0 + 0.01 * jax.random.normal(
            k_g, (hidden_size,), jnp.float32),
        "ln_beta": 0.01 * jax.random.normal(
            k_be, (hidden_size,), jnp.float32),
    }

    # One-time prep: weight transpose + bf16 cast, hoisted out of the call path.
    prepared = prepare_params(params, compute_dtype=jnp.bfloat16)

    out = bert_output(hidden_states, input_tensor, prepared, eps=layer_norm_eps)
    out = jax.block_until_ready(out)

    ref = _reference(hidden_states, input_tensor, params, eps=layer_norm_eps)
    assert out.shape == (batch, seq, hidden_size)
    # bf16 MXU matmul (f32 accumulation) vs f32 reference.
    assert jnp.allclose(out, ref, atol=3e-2, rtol=3e-2), "mismatch vs reference"

    print("KERNEL_OK")
</pallas_src>

<mosaic_0001>
module attributes {stable_mosaic.version = 11 : i64} {
  func.func @_bert_output_resident_kernel(%arg0: i32, %arg1: memref<8x128xbf16, #tpu.memory_space<vmem>>, %arg2: memref<128x32xbf16, #tpu.memory_space<vmem>>, %arg3: memref<1x32xf32, #tpu.memory_space<vmem>>, %arg4: memref<8x32xf32, #tpu.memory_space<vmem>>, %arg5: memref<1x32xf32, #tpu.memory_space<vmem>>, %arg6: memref<1x32xf32, #tpu.memory_space<vmem>>, %arg7: memref<8x32xf32, #tpu.memory_space<vmem>>) attributes {dimension_semantics = [#tpu.dimension_semantics<parallel>], iteration_bounds = array<i64: 2>, scalar_prefetch = 0 : i64, scratch_operands = 0 : i64, tpu.core_type = #tpu.core_type<tc>, window_params = [{transform_indices = @transform_0, window_bounds = array<i64: 8, 128>}, {pipeline_mode = #tpu.pipeline_mode<synchronous>, transform_indices = @transform_1, window_bounds = array<i64: 128, 32>}, {pipeline_mode = #tpu.pipeline_mode<synchronous>, transform_indices = @transform_2, window_bounds = array<i64: 1, 32>}, {transform_indices = @transform_3, window_bounds = array<i64: 8, 32>}, {pipeline_mode = #tpu.pipeline_mode<synchronous>, transform_indices = @transform_4, window_bounds = array<i64: 1, 32>}, {pipeline_mode = #tpu.pipeline_mode<synchronous>, transform_indices = @transform_5, window_bounds = array<i64: 1, 32>}, {transform_indices = @transform_6, window_bounds = array<i64: 8, 32>}]} {
    %c0 = arith.constant 0 : index
    %c0_0 = arith.constant 0 : index
    %0 = vector.load %arg1[%c0, %c0_0] : memref<8x128xbf16, #tpu.memory_space<vmem>>, vector<8x128xbf16>
    %c0_1 = arith.constant 0 : index
    %c0_2 = arith.constant 0 : index
    %1 = vector.load %arg2[%c0_1, %c0_2] : memref<128x32xbf16, #tpu.memory_space<vmem>>, vector<128x32xbf16>
    %cst = arith.constant dense<0.000000e+00> : vector<8x32xf32>
    %2 = tpu.matmul %0, %1, %cst {dimension_numbers = #tpu.dot_dimension_numbers<[1], [0], [0], [1], [0, 0, 1, 1], [], []>} : vector<8x128xbf16>, vector<128x32xbf16>, vector<8x32xf32> -> vector<8x32xf32>
    %c0_3 = arith.constant 0 : index
    %c0_4 = arith.constant 0 : index
    %3 = vector.load %arg3[%c0_3, %c0_4] : memref<1x32xf32, #tpu.memory_space<vmem>>, vector<1x32xf32>
    %4 = vector.broadcast %3 : vector<1x32xf32> to vector<8x32xf32>
    %5 = arith.addf %2, %4 : vector<8x32xf32>
    %c0_5 = arith.constant 0 : index
    %c0_6 = arith.constant 0 : index
    %6 = vector.load %arg4[%c0_5, %c0_6] : memref<8x32xf32, #tpu.memory_space<vmem>>, vector<8x32xf32>
    %7 = arith.addf %5, %6 : vector<8x32xf32>
    %cst_7 = arith.constant dense<0.000000e+00> : vector<8xf32>
    %8 = vector.multi_reduction <add>, %7, %cst_7 [1] : vector<8x32xf32> to vector<8xf32>
    %9 = vector.shape_cast %8 : vector<8xf32> to vector<8x1xf32>
    %cst_8 = arith.constant 3.200000e+01 : f32
    %10 = vector.broadcast %cst_8 : f32 to vector<8x1xf32>
    %11 = arith.divf %9, %10 : vector<8x1xf32>
    %12 = vector.broadcast %11 : vector<8x1xf32> to vector<8x32xf32>
    %13 = arith.subf %7, %12 : vector<8x32xf32>
    %14 = arith.mulf %13, %13 : vector<8x32xf32>
    %cst_9 = arith.constant dense<0.000000e+00> : vector<8xf32>
    %15 = vector.multi_reduction <add>, %14, %cst_9 [1] : vector<8x32xf32> to vector<8xf32>
    %16 = vector.shape_cast %15 : vector<8xf32> to vector<8x1xf32>
    %cst_10 = arith.constant 3.200000e+01 : f32
    %17 = vector.broadcast %cst_10 : f32 to vector<8x1xf32>
    %18 = arith.divf %16, %17 : vector<8x1xf32>
    %cst_11 = arith.constant 9.99999996E-13 : f32
    %19 = vector.broadcast %cst_11 : f32 to vector<8x1xf32>
    %20 = arith.addf %18, %19 : vector<8x1xf32>
    %21 = math.rsqrt %20 : vector<8x1xf32>
    %22 = vector.broadcast %21 : vector<8x1xf32> to vector<8x32xf32>
    %23 = arith.mulf %13, %22 : vector<8x32xf32>
    %c0_12 = arith.constant 0 : index
    %c0_13 = arith.constant 0 : index
    %24 = vector.load %arg5[%c0_12, %c0_13] : memref<1x32xf32, #tpu.memory_space<vmem>>, vector<1x32xf32>
    %25 = vector.broadcast %24 : vector<1x32xf32> to vector<8x32xf32>
    %26 = arith.mulf %23, %25 : vector<8x32xf32>
    %c0_14 = arith.constant 0 : index
    %c0_15 = arith.constant 0 : index
    %27 = vector.load %arg6[%c0_14, %c0_15] : memref<1x32xf32, #tpu.memory_space<vmem>>, vector<1x32xf32>
    %28 = vector.broadcast %27 : vector<1x32xf32> to vector<8x32xf32>
    %29 = arith.addf %26, %28 : vector<8x32xf32>
    %c0_16 = arith.constant 0 : index
    %c0_17 = arith.constant 0 : index
    %30 = vector.load %arg7[%c0_16, %c0_17] : memref<8x32xf32, #tpu.memory_space<vmem>>, vector<8x32xf32>
    tpu.vector_store %arg7[%c0_16, %c0_17], %29 {strides = array<i32>} : memref<8x32xf32, #tpu.memory_space<vmem>>, vector<8x32xf32>,
    return
  }
  func.func @transform_0(%arg0: i32) -> (i32, i32) {
    %c0_i32 = arith.constant 0 : i32
    %c0_i32_0 = arith.constant 0 : i32
    return %arg0, %c0_i32 : i32, i32
  }
  func.func @transform_1(%arg0: i32) -> (i32, i32) {
    %c0_i32 = arith.constant 0 : i32
    %c0_i32_0 = arith.constant 0 : i32
    %c0_i32_1 = arith.constant 0 : i32
    return %c0_i32, %c0_i32_0 : i32, i32
  }
  func.func @transform_2(%arg0: i32) -> (i32, i32) {
    %c0_i32 = arith.constant 0 : i32
    %c0_i32_0 = arith.constant 0 : i32
    %c0_i32_1 = arith.constant 0 : i32
    return %c0_i32, %c0_i32_0 : i32, i32
  }
  func.func @transform_3(%arg0: i32) -> (i32, i32) {
    %c0_i32 = arith.constant 0 : i32
    %c0_i32_0 = arith.constant 0 : i32
    return %arg0, %c0_i32 : i32, i32
  }
  func.func @transform_4(%arg0: i32) -> (i32, i32) {
    %c0_i32 = arith.constant 0 : i32
    %c0_i32_0 = arith.constant 0 : i32
    %c0_i32_1 = arith.constant 0 : i32
    return %c0_i32, %c0_i32_0 : i32, i32
  }
  func.func @transform_5(%arg0: i32) -> (i32, i32) {
    %c0_i32 = arith.constant 0 : i32
    %c0_i32_0 = arith.constant 0 : i32
    %c0_i32_1 = arith.constant 0 : i32
    return %c0_i32, %c0_i32_0 : i32, i32
  }
  func.func @transform_6(%arg0: i32) -> (i32, i32) {
    %c0_i32 = arith.constant 0 : i32
    %c0_i32_0 = arith.constant 0 : i32
    return %arg0, %c0_i32 : i32, i32
  }
}

</mosaic_0001>

<bundles_post_ra>
// kernel: tpu_custom_call.1
= control target key start
LH: loop header
LB: loop body
LE: loop exit
PB: predicated region body
PF: predicated region fallthrough
CT: control target
= control target key end

     0   :  { %11 = vsyncpa [#allocation3], 0  ;;  %s824_s0 = inlined_call_operand.vmem [shape: bf16[16,128], index: 0, kind: input, shape index: {}]   ;;  %s825_s1 = inlined_call_operand.vmem [shape: bf16[128,32], index: 1, kind: input, shape index: {}]   ;;  %s826_s2 = inlined_call_operand.vmem [shape: f32[1,32], index: 2, kind: input, shape index: {}]   ;;  %s827_s3 = inlined_call_operand.vmem [shape: f32[16,32], index: 3, kind: input, shape index: {}]   ;;  %s828_s4 = inlined_call_operand.vmem [shape: f32[1,32], index: 4, kind: input, shape index: {}]   ;;  %s829_s5 = inlined_call_operand.vmem [shape: f32[1,32], index: 5, kind: input, shape index: {}]   ;;  %s830_s6 = inlined_call_operand.hbm [shape: f32[16,32], index: 6, kind: output, shape index: {}]  }
   0x1   :  { %13 = vsyncpa [#allocation3 + $0x1], 0  ;;  %s698_s21 = smov 0   ;;  %s700_s22 = smov 0  }
   0x2   :  { %s702_s23 = smov 0   ;;  %s704_s24 = smov 0  }
   0x3 LB: > { %s719_s25 = sadd.s32 4294967295, %s658_s24   ;;  %s496_s26 = sadd.s32 4294967294, %s658_s24   ;;  %s658_s24 = sphi %s704_s24, %s836_s24   ;;  %s654_s23 = sphi %s702_s23, %s835_s23   ;;  %s650_s22 = sphi %s700_s22, %s834_s22   ;;  %s646_s21 = sphi %s698_s21, %s833_s21  }
   0x4   : > { %s723_s27 = sadd.s32 1, %s658_s24   ;;  %s162_s28 = sadd.s32 1, %s654_s23 }
   0x5   : > { %s159_s29 = ssub.s32 %s658_s24, %s723_s27  ;;  %p172_p0 = scmp.ne.s32.totalorder %s654_s23, %s650_s22 }
   0x6   : > { %p160_p1 = scmp.eq.s32.totalorder %s159_s29, 0  ;;  %p173_p2 = scmp.eq.s32.totalorder %s719_s25, 1 }
   0x7   : > { %p178_p3 = scmp.ne.s32.totalorder %s650_s22, %s646_s21  ;;  %p179_p4 = scmp.eq.s32.totalorder %s496_s26, 1 }
   0x8   : > { %s734_s30 = scalar_select %p160_p1, %s654_s23, %s162_s28  }
   0x9   : > { %p736_p5 = por %p173_p2, %p172_p0  ;;  %p740_p6 = por %p179_p4, %p178_p3 }
   0xa   : > { %p499_p7 = scmp.ge.s32.totalorder %s658_s24, 1  ;;  %p223_p8 = scmp.lt.s32.totalorder %s658_s24, 3 }
   0xc   : > { %p224_p9 = pnand %p499_p7, %p223_p8 }
   0xd   : > { %p256_p10 = scmp.lt.s32.totalorder (!%p224_p9), %s719_s25, 1  ;;  %s515_s12 = sshll.u32 (!%p224_p9), %s719_s25, 7 }
   0xe   : > { %227 = sbr.rel (%p224_p9) target bundleno = 570 (0x23a), region = 44  ;;  %s423_s17 = scalar_lea.hbm (!%p224_p9), %s830_s6, %s515_s12 }
   0xf   : > { %s662_s20 = smov (!%p224_p9), [#allocation2]  }
  0x10   : > { %s602_s29 = sshll.u32 (!%p224_p9), %s662_s20, 4  ;;  %s603_s29 = int_to_ptr.vmem [resolvable:$false] %s602_s29 }
  0x13   : > { %v588_v0 = vld [vmem:[%s825_s1 + $0x38] sm:$0xff]   ;;  %v660_v1 = vmov 0.0   ;;  %v589_v2 = vld [vmem:[%s825_s1 + $0x30] sm:$0xff]   ;;  %vm661_vm0 = vmmov 0   ;;  %v590_v3 = vld [vmem:[%s825_s1 + $0x28] sm:$0xff]   ;;  %s257_s26 = scalar_select %p256_p10, %s719_s25, 1 }
  0x14   : > { %527 = vmatprep.subr.bf16.mxu0 %v660_v1  ;;  %543 = vmatprep.mubr.msk.bf16.mxu0 %vm661_vm0, %v660_v1  ;;  %v591_v4 = vld [vmem:[%s825_s1 + $0x20] sm:$0xff]   ;;  %v592_v5 = vld [vmem:[%s825_s1 + $0x18] sm:$0xff]   ;;  %v593_v6 = vld [vmem:[%s825_s1 + $0x10] sm:$0xff]   ;;  %vm379_vm1 = vcmask 261120   ;;  %s604_s25 = scalar_lea.vmem %s603_s29, 256 }
  0x15   : > { %528 = vmatpush3.bf16.msra.mxu0 %v588_v0  ;;  %v594_v7 = vld [vmem:[%s825_s1 + $0x8] sm:$0xff]   ;;  %s501_s9 = sshll.u32 %s257_s26, 2  ;;  %v595_v8 = vld [vmem:[%s825_s1] sm:$0xff]   ;;  %s502_s15 = sshll.u32 %s257_s26, 3 }
  0x16   : > { %529 = vmatprep.subr.bf16.mxu0 %v660_v1  ;;  %s259_s14 = scalar_lea.vmem %s824_s0, %s501_s9  ;;  %s263_s18 = scalar_lea.vmem %s827_s3, %s502_s15  ;;  %v503_v10 = vld [vmem:[%s826_s2] ss:$0 sm:$0xff] }
  0x17   : > { %v265_v9 = vld [vmem:[%s259_s14] sm:$0xf]  ;;  %s253_s26 = sand.u32 1, %s650_s22  }
  0x18   : > { %v377_v12 = vld [vmem:[%s263_s18] sm:$0xff]  ;;  %s500_s28 = sshll.u32 %s253_s26, 3  ;;  %s412_s18 = scalar_lea.sflag [#allocation3], %s253_s26 }
  0x19   : > { %530 = vmatpush3.bf16.msra.mxu0 %v589_v2  ;;  %v512_v28 = vld [vmem:[%s828_s4] ss:$0 sm:$0xff]  ;;  %s255_s13 = scalar_lea.vmem [#allocation2], %s500_s28 }
  0x1a   : > { %531 = vmatprep.subr.bf16.mxu0 %v660_v1  ;;  %v513_v30 = vld [vmem:[%s829_s5] ss:$0 sm:$0xff]  ;;  %s425_s14 = sshll.u32 %s255_s13, 4  ;;  %s426_s14 = int_to_ptr.vmem [resolvable:$true] %s425_s14 }
  0x1b   : > { %s598_s19 = scalar_lea.vmem %s426_s14, 128  ;;  %p605_p0 = scmp.lt.s32.totalorder %s426_s14, %s603_s29 }
  0x1c   : > { %p599_p11 = scmp.ne.s32.totalorder %s426_s14, %s598_s19  ;;  %p606_p1 = scmp.lt.s32.totalorder %s604_s25, %s598_s19 }
  0x1d   : > { %532 = vmatpush3.bf16.msra.mxu0 %v590_v3 }
  0x1e   : > { %533 = vmatprep.subr.bf16.mxu0 %v660_v1  ;;  %p600_p12 = pnand %p599_p11, %p736_p5  ;;  %p607_p2 = por %p606_p1, %p605_p0 }
  0x20   : > { %p601_p13 = pneg %p600_p12 }
  0x21   : > { %534 = vmatpush3.bf16.msra.mxu0 %v591_v4 }
  0x22   : > { %535 = vmatprep.subr.bf16.mxu0 %v660_v1  ;;  %p608_p3 = pnand %p607_p2, %p601_p13 }
  0x25   : > { %536 = vmatpush3.bf16.msra.mxu0 %v592_v5 }
  0x26   : > { %537 = vmatprep.subr.bf16.mxu0 %v660_v1 }
  0x29   : > { %538 = vmatpush3.bf16.msra.mxu0 %v593_v6 }
  0x2a   : > { %539 = vmatprep.subr.bf16.mxu0 %v660_v1 }
  0x2d   : > { %540 = vmatpush3.bf16.msra.mxu0 %v594_v7 }
  0x2e   : > { %541 = vmatprep.subr.bf16.mxu0 %v660_v1 }
  0x31   : > { %542 = vmatpush3.bf16.msra.mxu0 %v595_v8 }
  0x34   : > { %544 = vmatmul.mubr.bf16.vlgmr.msra.gmra.mxu0 %v265_v9 }
  0xf4   : > { %v371_v11 = vpop.f32.mrf.mxu0 }
  0xf5   : > { %v372_v13 = vadd.f32 %v503_v10, %v371_v11 }
  0xf6   : > { %v545_v14 = vpop.f32.mrf.mxu0 }
  0xf7   : > { %v378_v15 = vadd.f32 %v377_v12, %v372_v13 }
  0xf8   : > { %v374_v16 = vpop.f32.mrf.mxu0 }
  0xf9   : > { %v380_v17 = vsel %vm379_vm1, %v378_v15, 0.0 }
  0xfa   : > { %381 = vadd.xlane.f32.xlu0 %v380_v17  ;;  %v546_v18 = vpop.f32.mrf.mxu0 }
 0x183   : > { %v382_v19 = vpop.xlane.xlu0 %381 }
 0x184   : > { %v384_v20 = vmul.f32 0.03125, %v382_v19 }
 0x186   : > { %v385_v21 = vsub.f32 %v378_v15, %v384_v20 }
 0x188   : > { %v386_v22 = vmul.f32 %v385_v21, %v385_v21 }
 0x18a   : > { %v387_v23 = vsel %vm379_vm1, %v386_v22, 0.0 }
 0x18b   : > { %388 = vadd.xlane.f32.xlu0 %v387_v23 }
 0x214   : > { %v389_v24 = vpop.xlane.xlu0 %388 }
 0x215   : > { %v390_v25 = vmul.f32 0.03125, %v389_v24 }
 0x217   : > { %v391_v26 = vadd.f32 1e-12, %v390_v25 }
 0x219   : > { %596 = vrsqrt.f32 %v391_v26 }
 0x226   : > { %v597_v27 = vpop.eup %596 }
 0x227   : > { %v393_v29 = vmul.f32 %v597_v27, %v385_v21 }
 0x229   : > { %v401_v31 = vmul.f32 %v512_v28, %v393_v29 }
 0x22b   : > { %v409_v32 = vadd.f32 %v513_v30, %v401_v31 }
 0x22d   : > { %410 = vst.msk [vmem:[%s255_s13] sm:$0xff] %vm379_vm1, %v409_v32 }
 0x22e   : > { %611 = shalt.err (!%p608_p3)
}
 0x22f   : > { %s612_s28 = scalar_lea.hbm %s423_s17, 128  ;;  %s616_s10 = scalar_lea.hbm %s830_s6, 256 }
 0x230   : > { %p613_p4 = scmp.ne.s32.totalorder %s423_s17, %s612_s28  ;;  %p617_p9 = scmp.lt.s32.totalorder %s423_s17, %s830_s6 }
 0x231   : > { %p618_p10 = scmp.lt.s32.totalorder %s616_s10, %s612_s28 }
 0x232   : > { %p614_p7 = pnand %p613_p4, %p736_p5 }
 0x233   : > { %p619_p11 = por %p618_p10, %p617_p9 }
 0x234   : > { %p615_p8 = pneg %p614_p7 }
 0x236   : > { %p620_p12 = pnand %p619_p11, %p615_p8 }
 0x238   : > { %623 = shalt.err (!%p620_p12)
}
 0x239   : > { %547 = dma.vmem_to_hbm [thread:$0]  (%p736_p5), %s426_s14, 128, %s423_s17, %s412_s18  }
 0x23a PF: > { %p553_p13 = scmp.ge.s32.totalorder %s658_s24, 2  ;;  %s437_s13 = sand.u32 1, %s646_s21  }
 0x23b   : > { %s438_s15 = scalar_lea.sflag [#allocation3], %s437_s13 }
 0x23c   : > { %p550_p0 = pnand %p553_p13, %p740_p6 }
 0x23e   : > { %p551_p1 = pneg %p550_p0 }
 0x240   : > { %641 = dma.done.wait (%p551_p1), %s438_s15, 128  }
 0x241   : > { %643 = vsyncadd (%p551_p1), %s438_s15, 4294967168  ;;  %p16_p2 = scmp.ge.s32.totalorder %s723_s27, 4   ;;  %s833_s21 = smov %s650_s22 }
 0x242   : > { %s834_s22 = smov %s654_s23  ;;  %s835_s23 = smov %s734_s30 }
 0x243   : > { %s836_s24 = smov %s723_s27  ;;  %18 = sbr.rel (!%p16_p2) target bundleno = 3 (0x3), region = 82 }
 0x248   :  { %443 = vsyncpa [#allocation3], 1 }
 0x249   :  { %445 = vsyncpa [#allocation3 + $0x1], 1 }

</bundles_post_ra>
